<compile_context>
chip_gen: v7x
topology: tpu7x:2x2x1
jax: 0.10.0
libtpu: 0.0.40
codegen_flags: <defaults>
</compile_context>

<pallas_src>
import functools

import jax
import jax.numpy as jnp
from jax.experimental import pallas as pl
from jax.experimental.pallas import tpu as pltpu

MAX_LENGTH = 16   # attention window (encoder_outputs has MAX_LENGTH rows)
LANE = 128


def _round_up(x, m):
    return (x + m - 1) // m * m


def _aligned_offsets(named_widths):
    """128-lane-aligned packing offsets; single source of truth for the slabs."""
    offs, cur = {}, 0
    for name, w in named_widths:
        offs[name] = cur
        cur += _round_up(w, LANE)
    return offs, cur


def slab_layout(L, H, O):
    """Shared by pack_params and the kernel (prevents offset drift)."""
    w_offs, w_total = _aligned_offsets([
        ("attn_we", L), ("comb_we", H),        # fused RHS for  emb @ [...]
        ("attn_wh", L), ("w_hh", 3 * H),       # fused RHS for  hid @ [...]
        ("comb_wa", H), ("w_ih", 3 * H), ("out_w", O),
    ])
    b_offs, b_total = _aligned_offsets([
        ("attn_b", L), ("comb_b", H), ("b_ih", 3 * H), ("b_hh", 3 * H), ("out_b", O),
    ])
    return w_offs, w_total, b_offs, b_total


def attn_decoder_kernel(ids_ref, tab_ref, hid_ref, enc_ref, w_ref, b_ref, out_ref,
                        *, B, L, H, O, w_offs, b_offs):
    f32 = jnp.float32
    Op = _round_up(O, LANE)

    # ---- embedded = relu(embedding(input)) : in-kernel gather via one-hot MXU matmul.
    # input_ids live in SMEM; vocab is small so a (B, O) one-hot is cheap.
    col = jax.lax.broadcasted_iota(jnp.int32, (B, O), 1)
    row = jax.lax.broadcasted_iota(jnp.int32, (B, O), 0)
    onehot = jnp.zeros((B, O), f32)
    for b in range(B):                       # unrolled; B is tiny
        onehot = jnp.where((row == b) & (col == ids_ref[b]), 1.0, onehot)
    emb = jnp.maximum(
        jnp.dot(onehot, tab_ref[...], preferred_element_type=f32), 0.0)       # (B, E)
    # TODO(synk): nn.Dropout(p=0.1) training-mode mask not implemented (eval-mode identity).

    hid = hid_ref[0]                                                          # (B, H)

    # ---- fused, 128-lane-aligned projections of the two shared LHS operands.
    emb_w0 = w_offs["attn_we"]
    comb_loc = w_offs["comb_we"] - emb_w0                 # lane offset of comb part (128-aligned)
    emb_fw = comb_loc + _round_up(H, LANE)
    hid_w0 = w_offs["attn_wh"]
    gh_loc = w_offs["w_hh"] - hid_w0                      # lane offset of gh part (128-aligned)
    hid_fw = gh_loc + _round_up(3 * H, LANE)

    emb_proj = jnp.dot(emb, w_ref[:, emb_w0:emb_w0 + emb_fw],
                       preferred_element_type=f32)        # [attn(emb) |pad| comb(emb) |pad]
    hid_proj = jnp.dot(hid, w_ref[:, hid_w0:hid_w0 + hid_fw],
                       preferred_element_type=f32)        # [attn(hid) |pad| gh(r|z|n) |pad]

    # ---- attn_weights = softmax(attn(cat(embedded, hidden)), dim=1)
    attn_logits = (emb_proj[:, :L] + hid_proj[:, :L]
                   + b_ref[:, b_offs["attn_b"]:b_offs["attn_b"] + L])
    m1 = jnp.max(attn_logits, axis=1, keepdims=True)
    e1 = jnp.exp(attn_logits - m1)
    attn_w = e1 * pl.reciprocal(jnp.sum(e1, axis=1, keepdims=True), approx=True)

    # attn_applied = bmm(attn_weights[None], encoder_outputs[None])[0]
    attn_applied = jnp.dot(attn_w, enc_ref[...], preferred_element_type=f32)  # (B, H)

    # ---- output = relu(attn_combine(cat(embedded, attn_applied)))
    comb = (emb_proj[:, comb_loc:comb_loc + H]
            + jnp.dot(attn_applied,
                      w_ref[:, w_offs["comb_wa"]:w_offs["comb_wa"] + H],
                      preferred_element_type=f32)
            + b_ref[:, b_offs["comb_b"]:b_offs["comb_b"] + H])
    x = jnp.maximum(comb, 0.0)                                                # (B, H)

    # ---- single-step GRU, PyTorch gate order (r, z, n); gates stacked along lanes.
    gi = (jnp.dot(x, w_ref[:, w_offs["w_ih"]:w_offs["w_ih"] + 3 * H],
                  preferred_element_type=f32)
          + b_ref[:, b_offs["b_ih"]:b_offs["b_ih"] + 3 * H])
    gh = (hid_proj[:, gh_loc:gh_loc + 3 * H]
          + b_ref[:, b_offs["b_hh"]:b_offs["b_hh"] + 3 * H])

    rz = jax.nn.sigmoid(gi[:, :2 * H] + gh[:, :2 * H])
    r, z = rz[:, :H], rz[:, H:]
    n = jnp.tanh(gi[:, 2 * H:] + r * gh[:, 2 * H:])
    h_new = (1.0 - z) * n + z * hid                                           # (B, H)

    # ---- prediction = log_softmax(out(h_new), dim=1), computed at the padded
    # 128-lane width (weight/bias pad columns are zero) with pad lanes masked to -inf,
    # then stored with one aligned lane-dense store.
    logits = (jnp.dot(h_new, w_ref[:, w_offs["out_w"]:w_offs["out_w"] + Op],
                      preferred_element_type=f32)
              + b_ref[:, b_offs["out_b"]:b_offs["out_b"] + Op])
    lane = jax.lax.broadcasted_iota(jnp.int32, (B, Op), 1)
    logits = jnp.where(lane < O, logits, -jnp.inf)
    m2 = jnp.max(logits, axis=1, keepdims=True)
    lse = jnp.log(jnp.sum(jnp.exp(logits - m2), axis=1, keepdims=True)) + m2

    out_ref[:, :Op] = logits - lse      # pred (pad lanes hold -inf; wrapper slices them off)
    out_ref[:, Op:Op + H] = h_new       # new hidden state (lanes past Op+H left unwritten)


def pack_params(params):
    """Pack logical parameters into one 128-aligned weight slab and one bias slab (done once)."""
    H = params["w_ih"].shape[-1]
    L = params["attn_we"].shape[-1]
    O = params["out_w"].shape[-1]
    w_offs, w_total, b_offs, b_total = slab_layout(L, H, O)

    w_hh_s = jnp.concatenate([params["w_hh"][i] for i in range(3)], axis=1)   # (H, 3H)
    w_ih_s = jnp.concatenate([params["w_ih"][i] for i in range(3)], axis=1)   # (H, 3H)
    b_ih_s = jnp.concatenate([params["b_ih"][i] for i in range(3)], axis=1)   # (1, 3H)
    b_hh_s = jnp.concatenate([params["b_hh"][i] for i in range(3)], axis=1)   # (1, 3H)

    w_parts = dict(attn_we=params["attn_we"], comb_we=params["comb_we"],
                   attn_wh=params["attn_wh"], w_hh=w_hh_s,
                   comb_wa=params["comb_wa"], w_ih=w_ih_s, out_w=params["out_w"])
    b_parts = dict(attn_b=params["attn_b"], comb_b=params["comb_b"],
                   b_ih=b_ih_s, b_hh=b_hh_s, out_b=params["out_b"])

    w_slab = jnp.zeros((H, w_total), jnp.float32)
    for name, p in w_parts.items():
        o = w_offs[name]
        w_slab = w_slab.at[:, o:o + p.shape[1]].set(p.astype(jnp.float32))
    b_slab = jnp.zeros((1, b_total), jnp.float32)
    for name, p in b_parts.items():
        o = b_offs[name]
        b_slab = b_slab.at[:, o:o + p.shape[1]].set(p.astype(jnp.float32))

    return dict(embedding=params["embedding"].astype(jnp.float32),
                w_slab=w_slab, b_slab=b_slab)


@jax.jit
def attn_decoder_forward(packed, input_ids, hidden, encoder_outputs):
    """input_ids: (B,) int32; hidden: (1, B, H); encoder_outputs: (MAX_LENGTH, H)."""
    B = input_ids.shape[0]
    H = hidden.shape[-1]
    O, E = packed["embedding"].shape
    L = encoder_outputs.shape[0]
    assert E == H, "forward() requires embbed_dim == hidden_dim (cat feeds Linear(2H, L))"

    w_offs, _, b_offs, _ = slab_layout(L, H, O)
    Op = _round_up(O, LANE)
    Hp = _round_up(H, LANE)

    smem = pl.BlockSpec(memory_space=pltpu.MemorySpace.SMEM)
    vmem = pl.BlockSpec(memory_space=pltpu.MemorySpace.VMEM)

    out = pl.pallas_call(
        functools.partial(attn_decoder_kernel, B=B, L=L, H=H, O=O,
                          w_offs=w_offs, b_offs=b_offs),
        out_shape=jax.ShapeDtypeStruct((B, Op + Hp), jnp.float32),
        in_specs=[smem, vmem, vmem, vmem, vmem, vmem],
        out_specs=vmem,
    )(input_ids.astype(jnp.int32), packed["embedding"], hidden,
      encoder_outputs, packed["w_slab"], packed["b_slab"])

    pred = out[:, :O]
    h_new = out[:, Op:Op + H]
    return pred, h_new[None]


def init_params(key, output_dim, hidden_dim, embbed_dim):
    H, E, O, L = hidden_dim, embbed_dim, output_dim, MAX_LENGTH
    assert E == H, "forward() requires embbed_dim == hidden_dim (cat feeds Linear(2H, L))"
    keys = jax.random.split(key, 12)

    def u(k, shape, scale):
        return jax.random.uniform(k, shape, jnp.float32, -scale, scale)

    s2h = float(1.0 / (2 * H) ** 0.5)
    sh = float(1.0 / H ** 0.5)

    emb = jax.random.normal(keys[0], (O, E), jnp.float32)
    attn_w = u(keys[1], (2 * H, L), s2h)          # [in, out] layout
    attn_b = u(keys[2], (1, L), s2h)
    comb_w = u(keys[3], (2 * H, H), s2h)
    comb_b = u(keys[4], (1, H), s2h)
    w_ih = u(keys[5], (3, H, H), sh)              # gates r, z, n stacked
    b_ih = u(keys[6], (3, 1, H), sh)
    w_hh = u(keys[7], (3, H, H), sh)
    b_hh = u(keys[8], (3, 1, H), sh)
    out_w = u(keys[9], (H, O), sh)
    out_b = u(keys[10], (1, O), sh)

    return dict(
        embedding=emb,
        attn_we=attn_w[:E], attn_wh=attn_w[E:], attn_b=attn_b,
        comb_we=comb_w[:E], comb_wa=comb_w[E:], comb_b=comb_b,
        w_ih=w_ih, b_ih=b_ih, w_hh=w_hh, b_hh=b_hh,
        out_w=out_w, out_b=out_b,
    )


def reference_forward(params, input_ids, hidden, encoder_outputs):
    """Pure-JAX reference matching the PyTorch forward (eval mode)."""
    emb = jnp.maximum(params["embedding"][input_ids], 0.0)
    hid = hidden[0]
    cat1 = jnp.concatenate([emb, hid], axis=1)
    attn_w_full = jnp.concatenate([params["attn_we"], params["attn_wh"]], axis=0)
    aw = jax.nn.softmax(cat1 @ attn_w_full + params["attn_b"], axis=1)
    applied = aw @ encoder_outputs
    cat2 = jnp.concatenate([emb, applied], axis=1)
    comb_w_full = jnp.concatenate([params["comb_we"], params["comb_wa"]], axis=0)
    x = jnp.maximum(cat2 @ comb_w_full + params["comb_b"], 0.0)
    gi = [x @ params["w_ih"][i] + params["b_ih"][i] for i in range(3)]
    gh = [hid @ params["w_hh"][i] + params["b_hh"][i] for i in range(3)]
    r = jax.nn.sigmoid(gi[0] + gh[0])
    z = jax.nn.sigmoid(gi[1] + gh[1])
    n = jnp.tanh(gi[2] + r * gh[2])
    h_new = (1.0 - z) * n + z * hid
    pred = jax.nn.log_softmax(h_new @ params["out_w"] + params["out_b"], axis=1)
    return pred, h_new[None]


if __name__ == "__main__":
    # Small shapes consistent with the module's forward.
    output_dim, hidden_dim, embbed_dim, num_layers = 64, 32, 32, 1
    B = 2

    key = jax.random.PRNGKey(0)
    k_param, k_in, k_hid, k_enc = jax.random.split(key, 4)

    params = init_params(k_param, output_dim, hidden_dim, embbed_dim)
    packed = pack_params(params)

    input_ids = jax.random.randint(k_in, (B,), 0, output_dim, dtype=jnp.int32)
    hidden = jax.random.normal(k_hid, (1, B, hidden_dim), jnp.float32)        # (num_layers, B, H)
    encoder_outputs = jax.random.normal(k_enc, (MAX_LENGTH, hidden_dim), jnp.float32)

    pred, new_hidden = attn_decoder_forward(packed, input_ids, hidden, encoder_outputs)
    jax.block_until_ready((pred, new_hidden))

    ref_pred, ref_hidden = reference_forward(params, input_ids, hidden, encoder_outputs)
    assert pred.shape == (B, output_dim) and new_hidden.shape == (1, B, hidden_dim)
    # 1e-3 tolerance: the attention-softmax normalization uses the EUP approximate
    # reciprocal (pl.reciprocal(approx=True)); everything else is exact f32.
    assert jnp.allclose(pred, ref_pred, atol=1e-3, rtol=1e-3)
    assert jnp.allclose(new_hidden, ref_hidden, atol=1e-3, rtol=1e-3)

    print("KERNEL_OK")
</pallas_src>

<mosaic_0001>
module attributes {stable_mosaic.version = 11 : i64} {
  func.func @attn_decoder_kernel(%arg0: memref<2xi32, #tpu.memory_space<smem>>, %arg1: memref<64x32xf32, #tpu.memory_space<vmem>>, %arg2: memref<1x2x32xf32, #tpu.memory_space<vmem>>, %arg3: memref<16x32xf32, #tpu.memory_space<vmem>>, %arg4: memref<32x896xf32, #tpu.memory_space<vmem>>, %arg5: memref<1x640xf32, #tpu.memory_space<vmem>>, %arg6: memref<2x256xf32, #tpu.memory_space<vmem>>) attributes {dimension_semantics = [], scalar_prefetch = 0 : i64, scratch_operands = 0 : i64, tpu.core_type = #tpu.core_type<tc>} {
    %0 = tpu.iota {dimensions = array<i32: 1>} : vector<2x64xi32>
    %1 = tpu.iota {dimensions = array<i32: 0>} : vector<2x64xi32>
    %cst = arith.constant 0.000000e+00 : f32
    %2 = vector.broadcast %cst : f32 to vector<2x64xf32>
    %c0_i32 = arith.constant 0 : i32
    %3 = vector.broadcast %c0_i32 : i32 to vector<2x64xi32>
    %4 = arith.cmpi eq, %1, %3 : vector<2x64xi32>
    %c0 = arith.constant 0 : index
    %5 = memref.load %arg0[%c0] : memref<2xi32, #tpu.memory_space<smem>>
    %6 = vector.broadcast %5 : i32 to vector<2x64xi32>
    %7 = arith.cmpi eq, %0, %6 : vector<2x64xi32>
    %8 = arith.andi %4, %7 : vector<2x64xi1>
    %cst_0 = arith.constant 1.000000e+00 : f32
    %9 = vector.broadcast %cst_0 : f32 to vector<2x64xf32>
    %10 = arith.select %8, %9, %2 : vector<2x64xi1>, vector<2x64xf32>
    %c1_i32 = arith.constant 1 : i32
    %11 = vector.broadcast %c1_i32 : i32 to vector<2x64xi32>
    %12 = arith.cmpi eq, %1, %11 : vector<2x64xi32>
    %c1 = arith.constant 1 : index
    %13 = memref.load %arg0[%c1] : memref<2xi32, #tpu.memory_space<smem>>
    %14 = vector.broadcast %13 : i32 to vector<2x64xi32>
    %15 = arith.cmpi eq, %0, %14 : vector<2x64xi32>
    %16 = arith.andi %12, %15 : vector<2x64xi1>
    %cst_1 = arith.constant 1.000000e+00 : f32
    %17 = vector.broadcast %cst_1 : f32 to vector<2x64xf32>
    %18 = arith.select %16, %17, %10 : vector<2x64xi1>, vector<2x64xf32>
    %c0_2 = arith.constant 0 : index
    %c0_3 = arith.constant 0 : index
    %19 = vector.load %arg1[%c0_2, %c0_3] : memref<64x32xf32, #tpu.memory_space<vmem>>, vector<64x32xf32>
    %cst_4 = arith.constant dense<0.000000e+00> : vector<2x32xf32>
    %20 = tpu.matmul %18, %19, %cst_4 {dimension_numbers = #tpu.dot_dimension_numbers<[1], [0], [0], [1], [0, 0, 1, 1], [], []>} : vector<2x64xf32>, vector<64x32xf32>, vector<2x32xf32> -> vector<2x32xf32>
    %cst_5 = arith.constant 0.000000e+00 : f32
    %21 = vector.broadcast %cst_5 : f32 to vector<2x32xf32>
    %22 = arith.maximumf %20, %21 : vector<2x32xf32>
    %c0_6 = arith.constant 0 : index
    %c0_7 = arith.constant 0 : index
    %c0_8 = arith.constant 0 : index
    %23 = vector.load %arg2[%c0_6, %c0_7, %c0_8] : memref<1x2x32xf32, #tpu.memory_space<vmem>>, vector<1x2x32xf32>
    %24 = vector.shape_cast %23 : vector<1x2x32xf32> to vector<2x32xf32>
    %c0_9 = arith.constant 0 : index
    %c0_10 = arith.constant 0 : index
    %25 = vector.load %arg4[%c0_9, %c0_10] : memref<32x896xf32, #tpu.memory_space<vmem>>, vector<32x256xf32>
    %cst_11 = arith.constant dense<0.000000e+00> : vector<2x256xf32>
    %26 = tpu.matmul %22, %25, %cst_11 {dimension_numbers = #tpu.dot_dimension_numbers<[1], [0], [0], [1], [0, 0, 1, 1], [], []>} : vector<2x32xf32>, vector<32x256xf32>, vector<2x256xf32> -> vector<2x256xf32>
    %c0_12 = arith.constant 0 : index
    %c256 = arith.constant 256 : index
    %27 = vector.load %arg4[%c0_12, %c256] : memref<32x896xf32, #tpu.memory_space<vmem>>, vector<32x256xf32>
    %cst_13 = arith.constant dense<0.000000e+00> : vector<2x256xf32>
    %28 = tpu.matmul %24, %27, %cst_13 {dimension_numbers = #tpu.dot_dimension_numbers<[1], [0], [0], [1], [0, 0, 1, 1], [], []>} : vector<2x32xf32>, vector<32x256xf32>, vector<2x256xf32> -> vector<2x256xf32>
    %29 = vector.extract_strided_slice %26 {offsets = [0, 0], sizes = [2, 16], strides = [1, 1]} : vector<2x256xf32> to vector<2x16xf32>
    %30 = vector.extract_strided_slice %28 {offsets = [0, 0], sizes = [2, 16], strides = [1, 1]} : vector<2x256xf32> to vector<2x16xf32>
    %31 = arith.addf %29, %30 : vector<2x16xf32>
    %c0_14 = arith.constant 0 : index
    %c0_15 = arith.constant 0 : index
    %32 = vector.load %arg5[%c0_14, %c0_15] : memref<1x640xf32, #tpu.memory_space<vmem>>, vector<1x16xf32>
    %33 = vector.broadcast %32 : vector<1x16xf32> to vector<2x16xf32>
    %34 = arith.addf %31, %33 : vector<2x16xf32>
    %cst_16 = arith.constant dense<0xFF800000> : vector<2xf32>
    %35 = vector.multi_reduction <maximumf>, %34, %cst_16 [1] : vector<2x16xf32> to vector<2xf32>
    %36 = vector.shape_cast %35 : vector<2xf32> to vector<2x1xf32>
    %37 = vector.broadcast %36 : vector<2x1xf32> to vector<2x16xf32>
    %38 = arith.subf %34, %37 : vector<2x16xf32>
    %39 = math.exp %38 : vector<2x16xf32>
    %cst_17 = arith.constant dense<0.000000e+00> : vector<2xf32>
    %40 = vector.multi_reduction <add>, %39, %cst_17 [1] : vector<2x16xf32> to vector<2xf32>
    %41 = vector.shape_cast %40 : vector<2xf32> to vector<2x1xf32>
    %42 = tpu.reciprocal %41 {approx = true} : vector<2x1xf32> -> vector<2x1xf32>
    %43 = vector.broadcast %42 : vector<2x1xf32> to vector<2x16xf32>
    %44 = arith.mulf %39, %43 : vector<2x16xf32>
    %c0_18 = arith.constant 0 : index
    %c0_19 = arith.constant 0 : index
    %45 = vector.load %arg3[%c0_18, %c0_19] : memref<16x32xf32, #tpu.memory_space<vmem>>, vector<16x32xf32>
    %cst_20 = arith.constant dense<0.000000e+00> : vector<2x32xf32>
    %46 = tpu.matmul %44, %45, %cst_20 {dimension_numbers = #tpu.dot_dimension_numbers<[1], [0], [0], [1], [0, 0, 1, 1], [], []>} : vector<2x16xf32>, vector<16x32xf32>, vector<2x32xf32> -> vector<2x32xf32>
    %47 = vector.extract_strided_slice %26 {offsets = [0, 128], sizes = [2, 32], strides = [1, 1]} : vector<2x256xf32> to vector<2x32xf32>
    %c0_21 = arith.constant 0 : index
    %c512 = arith.constant 512 : index
    %48 = vector.load %arg4[%c0_21, %c512] : memref<32x896xf32, #tpu.memory_space<vmem>>, vector<32x32xf32>
    %cst_22 = arith.constant dense<0.000000e+00> : vector<2x32xf32>
    %49 = tpu.matmul %46, %48, %cst_22 {dimension_numbers = #tpu.dot_dimension_numbers<[1], [0], [0], [1], [0, 0, 1, 1], [], []>} : vector<2x32xf32>, vector<32x32xf32>, vector<2x32xf32> -> vector<2x32xf32>
    %50 = arith.addf %47, %49 : vector<2x32xf32>
    %c0_23 = arith.constant 0 : index
    %c128 = arith.constant 128 : index
    %51 = vector.load %arg5[%c0_23, %c128] : memref<1x640xf32, #tpu.memory_space<vmem>>, vector<1x32xf32>
    %52 = vector.broadcast %51 : vector<1x32xf32> to vector<2x32xf32>
    %53 = arith.addf %50, %52 : vector<2x32xf32>
    %cst_24 = arith.constant 0.000000e+00 : f32
    %54 = vector.broadcast %cst_24 : f32 to vector<2x32xf32>
    %55 = arith.maximumf %53, %54 : vector<2x32xf32>
    %c0_25 = arith.constant 0 : index
    %c640 = arith.constant 640 : index
    %56 = vector.load %arg4[%c0_25, %c640] : memref<32x896xf32, #tpu.memory_space<vmem>>, vector<32x96xf32>
    %cst_26 = arith.constant dense<0.000000e+00> : vector<2x96xf32>
    %57 = tpu.matmul %55, %56, %cst_26 {dimension_numbers = #tpu.dot_dimension_numbers<[1], [0], [0], [1], [0, 0, 1, 1], [], []>} : vector<2x32xf32>, vector<32x96xf32>, vector<2x96xf32> -> vector<2x96xf32>
    %c0_27 = arith.constant 0 : index
    %c256_28 = arith.constant 256 : index
    %58 = vector.load %arg5[%c0_27, %c256_28] : memref<1x640xf32, #tpu.memory_space<vmem>>, vector<1x96xf32>
    %59 = vector.broadcast %58 : vector<1x96xf32> to vector<2x96xf32>
    %60 = arith.addf %57, %59 : vector<2x96xf32>
    %61 = vector.extract_strided_slice %28 {offsets = [0, 128], sizes = [2, 96], strides = [1, 1]} : vector<2x256xf32> to vector<2x96xf32>
    %c0_29 = arith.constant 0 : index
    %c384 = arith.constant 384 : index
    %62 = vector.load %arg5[%c0_29, %c384] : memref<1x640xf32, #tpu.memory_space<vmem>>, vector<1x96xf32>
    %63 = vector.broadcast %62 : vector<1x96xf32> to vector<2x96xf32>
    %64 = arith.addf %61, %63 : vector<2x96xf32>
    %65 = vector.extract_strided_slice %60 {offsets = [0, 0], sizes = [2, 64], strides = [1, 1]} : vector<2x96xf32> to vector<2x64xf32>
    %66 = vector.extract_strided_slice %64 {offsets = [0, 0], sizes = [2, 64], strides = [1, 1]} : vector<2x96xf32> to vector<2x64xf32>
    %67 = arith.addf %65, %66 : vector<2x64xf32>
    %68 = arith.negf %67 : vector<2x64xf32>
    %69 = math.exp %68 : vector<2x64xf32>
    %cst_30 = arith.constant 1.000000e+00 : f32
    %70 = vector.broadcast %cst_30 : f32 to vector<2x64xf32>
    %71 = arith.addf %70, %69 : vector<2x64xf32>
    %72 = arith.divf %70, %71 : vector<2x64xf32>
    %73 = vector.extract_strided_slice %72 {offsets = [0, 0], sizes = [2, 32], strides = [1, 1]} : vector<2x64xf32> to vector<2x32xf32>
    %74 = vector.extract_strided_slice %72 {offsets = [0, 32], sizes = [2, 32], strides = [1, 1]} : vector<2x64xf32> to vector<2x32xf32>
    %75 = vector.extract_strided_slice %60 {offsets = [0, 64], sizes = [2, 32], strides = [1, 1]} : vector<2x96xf32> to vector<2x32xf32>
    %76 = vector.extract_strided_slice %64 {offsets = [0, 64], sizes = [2, 32], strides = [1, 1]} : vector<2x96xf32> to vector<2x32xf32>
    %77 = arith.mulf %73, %76 : vector<2x32xf32>
    %78 = arith.addf %75, %77 : vector<2x32xf32>
    %79 = math.tanh %78 : vector<2x32xf32>
    %cst_31 = arith.constant 1.000000e+00 : f32
    %80 = vector.broadcast %cst_31 : f32 to vector<2x32xf32>
    %81 = arith.subf %80, %74 : vector<2x32xf32>
    %82 = arith.mulf %81, %79 : vector<2x32xf32>
    %83 = arith.mulf %74, %24 : vector<2x32xf32>
    %84 = arith.addf %82, %83 : vector<2x32xf32>
    %c0_32 = arith.constant 0 : index
    %c768 = arith.constant 768 : index
    %85 = vector.load %arg4[%c0_32, %c768] : memref<32x896xf32, #tpu.memory_space<vmem>>, vector<32x128xf32>
    %cst_33 = arith.constant dense<0.000000e+00> : vector<2x128xf32>
    %86 = tpu.matmul %84, %85, %cst_33 {dimension_numbers = #tpu.dot_dimension_numbers<[1], [0], [0], [1], [0, 0, 1, 1], [], []>} : vector<2x32xf32>, vector<32x128xf32>, vector<2x128xf32> -> vector<2x128xf32>
    %c0_34 = arith.constant 0 : index
    %c512_35 = arith.constant 512 : index
    %87 = vector.load %arg5[%c0_34, %c512_35] : memref<1x640xf32, #tpu.memory_space<vmem>>, vector<1x128xf32>
    %88 = vector.broadcast %87 : vector<1x128xf32> to vector<2x128xf32>
    %89 = arith.addf %86, %88 : vector<2x128xf32>
    %90 = tpu.iota {dimensions = array<i32: 1>} : vector<2x128xi32>
    %c64_i32 = arith.constant 64 : i32
    %91 = vector.broadcast %c64_i32 : i32 to vector<2x128xi32>
    %92 = arith.cmpi slt, %90, %91 : vector<2x128xi32>
    %cst_36 = arith.constant 0xFF800000 : f32
    %93 = vector.broadcast %cst_36 : f32 to vector<2x128xf32>
    %94 = arith.select %92, %89, %93 : vector<2x128xi1>, vector<2x128xf32>
    %cst_37 = arith.constant dense<0xFF800000> : vector<2xf32>
    %95 = vector.multi_reduction <maximumf>, %94, %cst_37 [1] : vector<2x128xf32> to vector<2xf32>
    %96 = vector.shape_cast %95 : vector<2xf32> to vector<2x1xf32>
    %97 = vector.broadcast %96 : vector<2x1xf32> to vector<2x128xf32>
    %98 = arith.subf %94, %97 : vector<2x128xf32>
    %99 = math.exp %98 : vector<2x128xf32>
    %cst_38 = arith.constant dense<0.000000e+00> : vector<2xf32>
    %100 = vector.multi_reduction <add>, %99, %cst_38 [1] : vector<2x128xf32> to vector<2xf32>
    %101 = vector.shape_cast %100 : vector<2xf32> to vector<2x1xf32>
    %102 = math.log %101 : vector<2x1xf32>
    %103 = arith.addf %102, %96 : vector<2x1xf32>
    %104 = vector.broadcast %103 : vector<2x1xf32> to vector<2x128xf32>
    %105 = arith.subf %94, %104 : vector<2x128xf32>
    %c0_39 = arith.constant 0 : index
    %c0_40 = arith.constant 0 : index
    %106 = vector.load %arg6[%c0_39, %c0_40] : memref<2x256xf32, #tpu.memory_space<vmem>>, vector<2x128xf32>
    tpu.vector_store %arg6[%c0_39, %c0_40], %105 {strides = array<i32>} : memref<2x256xf32, #tpu.memory_space<vmem>>, vector<2x128xf32>,
    %c0_41 = arith.constant 0 : index
    %c128_42 = arith.constant 128 : index
    %107 = vector.load %arg6[%c0_41, %c128_42] : memref<2x256xf32, #tpu.memory_space<vmem>>, vector<2x32xf32>
    tpu.vector_store %arg6[%c0_41, %c128_42], %84 {strides = array<i32>} : memref<2x256xf32, #tpu.memory_space<vmem>>, vector<2x32xf32>,
    return
  }
}

</mosaic_0001>

<bundles_post_ra>
// kernel: attn_decoder_forward.1
= control target key start
LH: loop header
LB: loop body
LE: loop exit
PB: predicated region body
PF: predicated region fallthrough
CT: control target
= control target key end

     0   :  { %11 = vsyncpa [#allocation4], 0  ;;  %s1121_s0 = inlined_call_operand.vmem [shape: s32[2], index: 0, kind: input, shape index: {}]   ;;  %s1122_s1 = inlined_call_operand.vmem [shape: f32[64,32], index: 1, kind: input, shape index: {}]   ;;  %s1123_s2 = inlined_call_operand.vmem [shape: f32[1,2,32], index: 2, kind: input, shape index: {}]   ;;  %s1124_s3 = inlined_call_operand.vmem [shape: f32[16,32], index: 3, kind: input, shape index: {}]   ;;  %s1125_s4 = inlined_call_operand.hbm [shape: f32[32,896], index: 4, kind: input, shape index: {}]   ;;  %s1126_s5 = inlined_call_operand.vmem [shape: f32[1,640], index: 5, kind: input, shape index: {}]   ;;  %s1127_s6 = inlined_call_operand.vmem [shape: f32[2,256], index: 6, kind: output, shape index: {}]  }
   0x1   :  { %s19_s23 = sshll.u32 %s1121_s0, 4  ;;  %s20_s23 = int_to_ptr.vmem [resolvable:$true] %s19_s23 }
   0x2   :  { %12 = vsyncpa [#allocation3], 0  ;;  %s915_s24 = scalar_lea.vmem %s20_s23, 16  ;;  %p920_p1 = scmp.lt.s32.totalorder %s20_s23, %s20_s23 }
   0x3   :  { %p916_p0 = scmp.ne.s32.totalorder %s20_s23, %s915_s24  ;;  %p921_p2 = scmp.lt.s32.totalorder %s915_s24, %s915_s24 }
   0x5   :  { %p922_p3 = por %p921_p2, %p920_p1 }
   0x7   :  { %p923_p4 = pnand %p922_p3, %p916_p0 }
   0x9   :  { %926 = shalt.err (!%p923_p4)
}
   0xa   :  { %s953_s25 = smov [#allocation2]   ;;  %s954_s26 = smov [#allocation5]  }
   0xb   :  { %22 = dma.vmem_to_smem %s20_s23, 16, %s953_s25, [#allocation4]  }
   0xc   :  { %s34_s27 = sshll.u32 %s954_s26, 4  ;;  %s927_s30 = scalar_lea.hbm %s1125_s4, 3584  ;;  %s35_s27 = int_to_ptr.vmem [resolvable:$true] %s34_s27 }
   0xd   :  { %p928_p5 = scmp.ne.s32.totalorder %s1125_s4, %s927_s30  ;;  %p931_p6 = scmp.lt.u32.totalorder %s927_s30, %s1125_s4 }
   0xf   :  { %p933_p7 = pnand %p931_p6, %p928_p5 }
  0x11   :  { %936 = shalt.err (!%p933_p7)
}
  0x12   :  { %s937_s10 = scalar_lea.vmem %s35_s27, 3584  ;;  %p942_p9 = scmp.lt.s32.totalorder %s35_s27, %s35_s27 }
  0x13   :  { %p938_p8 = scmp.ne.s32.totalorder %s35_s27, %s937_s10  ;;  %p943_p10 = scmp.lt.s32.totalorder %s937_s10, %s937_s10 }
  0x15   :  { %p944_p11 = por %p943_p10, %p942_p9 }
  0x17   :  { %p945_p12 = pnand %p944_p11, %p938_p8 }
  0x19   :  { %948 = shalt.err (!%p945_p12)
}
  0x1a   :  { %s955_s11 = smov 896   ;;  %s956_s12 = smov 56  }
  0x1b   :  { %40 = dma.hbm_to_vmem [thread:$0]  %s1125_s4, 3584, %s35_s27, [#allocation3], %s955_s11, %s955_s11, %s956_s12  }
  0x1c   :  { %949 = dma.done.wait [#allocation4], 16  }
  0x1d   :  { %950 = vsyncadd [#allocation4], 4294967280 }
  0x1e   :  { %951 = dma.done.wait [#allocation3], 3584  }
  0x1f   :  { %952 = vsyncadd [#allocation3], 4294963712 }
  0x20   :  { %49 = sfence }
  0x21   :  { %v66_v0 = vld [vmem:[%s1122_s1] sm:$0xff]  ;;  %v67_v1 = vld [vmem:[%s1122_s1 + $0x8] sm:$0xff]  ;;  %v68_v2 = vld [vmem:[%s1122_s1 + $0x10] sm:$0xff]  ;;  %v50_v3 = vlaneseq  ;;  %v957_v4 = vmov 0.0|0.0   ;;  %vm958_vm0 = vmmov 0   ;;  %v959_v7 = vmov 0.0  }
  0x22   :  { %841 = vmatprep.subr.bf16.mxu0 %v957_v4  ;;  %v842_v5 = vpack.c.bf16 %v67_v1, %v66_v0  ;;  %v69_v6 = vld [vmem:[%s1122_s1 + $0x18] sm:$0xff]  ;;  %798 = vmatprep.mubr.msk.f32.mxu0 %vm958_vm0, %v959_v7  ;;  %s1029_s22 = sld [smem:[#allocation2]]  ;;  %v70_v8 = vld [vmem:[%s1122_s1 + $0x20] sm:$0xff]  ;;  %v71_v9 = vld [vmem:[%s1122_s1 + $0x28] sm:$0xff]  ;;  %s1039_s27 = sld [smem:[#allocation2 + $0x1]]  ;;  %vm74_vm7 = vcmask 523264  }
  0x23   :  { %v1037_v10 = vshrl.u32 %v50_v3, 7  ;;  %226 = vmatprep.mubr.f32.mxu1 %v959_v7  ;;  %v845_v11 = vpack.c.bf16 %v69_v6, %v68_v2  ;;  %v151_v12 = vld [vmem:[#allocation5 + $0x8] sm:$0xff]  ;;  %v153_v13 = vld [vmem:[#allocation5 + $0x40] sm:$0xff]  ;;  %v1043_v15 = vand.u32 127, %v50_v3  ;;  %v152_v17 = vld [vmem:[#allocation5 + $0x38] sm:$0xff]  ;;  %v848_v24 = vpack.c.bf16 %v71_v9, %v70_v8  ;;  %s961_s19 = smov 32  }
  0x24   :  { %843 = vmatpush3.bf16.msra.mxu0 %v842_v5  ;;  %v150_v14 = vld [vmem:[#allocation5] sm:$0xff]  ;;  %v853_v16 = vpack.c.bf16 %v153_v13, %v151_v12  ;;  %v155_v18 = vld [vmem:[#allocation5 + $0x78] sm:$0xff]  ;;  %v157_v19 = vld [vmem:[#allocation5 + $0xb0] sm:$0xff]  ;;  %vm158_vm8 = vcmask 261120   ;;  %vm324_vm9 = vcmask 123904   ;;  %vm338_vm10 = vcmask 130048  }
  0x25   :  { %844 = vmatprep.subr.bf16.mxu0 %v957_v4  ;;  %v855_v20 = vpack.c.bf16 %v152_v17, %v150_v14  ;;  %v857_v21 = vpack.c.bf16 %v157_v19, %v155_v18  ;;  %v154_v22 = vld [vmem:[#allocation5 + $0x70] sm:$0xff]  ;;  %v156_v23 = vld [vmem:[#allocation5 + $0xa8] sm:$0xff]  ;;  %vm54_vm1 = vcmp.eq.s32.totalorder %v1037_v10, 0  ;;  %v73_v28 = vld [vmem:[%s1122_s1 + $0x38] sm:$0xff]  ;;  %vm60_vm4 = vcmp.eq.s32.totalorder %v1037_v10, 1  ;;  %s962_s20 = smov 96  }
  0x26   :  { %854 = vmatprep.subr.bf16.mxu1 %v853_v16  ;;  %v859_v26 = vpack.c.bf16 %v156_v23, %v154_v22  ;;  %v72_v27 = vld [vmem:[%s1122_s1 + $0x30] sm:$0xff]  ;;  %v234_v33 = vld [vmem:[#allocation5 + $0x18] sm:$0xff]  ;;  %v235_v37 = vld [vmem:[#allocation5 + $0x48] sm:$0xff]  ;;  %vm706_vm11 = vcmp.lt.s32.totalorder %v1043_v15, 64  ;;  %vm708_vm12 = vcmask 1041408   ;;  %vm733_vm13 = vcmask 254976  }
  0x27   :  { %856 = vmatpush1.bf16.msra.mxu1 %v855_v20  ;;  %v851_v30 = vpack.c.bf16 %v73_v28, %v72_v27  ;;  %v236_v34 = vld [vmem:[#allocation5 + $0x50] sm:$0xff]  ;;  %v238_v38 = vld [vmem:[#allocation5 + $0x88] sm:$0xff]  ;;  %v240_v39 = vld [vmem:[#allocation5 + $0xc0] sm:$0xff] }
  0x28   :  { %846 = vmatpush3.bf16.msra.mxu0 %v845_v11  ;;  %v56_v25 = vstv %s1029_s22  ;;  %v62_v29 = vstv %s1039_s27  ;;  %858 = vmatprep.subr.bf16.mxu1 %v857_v21  ;;  %v861_v35 = vpack.c.bf16 %v236_v34, %v234_v33  ;;  %v233_v36 = vld [vmem:[#allocation5 + $0x10] sm:$0xff]  ;;  %v865_v44 = vpack.c.bf16 %v240_v39, %v238_v38  ;;  %v237_v45 = vld [vmem:[#allocation5 + $0x80] sm:$0xff]  ;;  %v239_v46 = vld [vmem:[#allocation5 + $0xb8] sm:$0xff] }
  0x29   :  { %847 = vmatprep.subr.bf16.mxu0 %v957_v4  ;;  %vm57_vm2 = vcmp.eq.s32.totalorder %v1043_v15, %v56_v25  ;;  %vm63_vm5 = vcmp.eq.s32.totalorder %v1043_v15, %v62_v29  ;;  %v863_v41 = vpack.c.bf16 %v235_v37, %v233_v36  ;;  %v867_v47 = vpack.c.bf16 %v239_v46, %v237_v45  ;;  %v1068_v48 = vld [vmem:[%s1123_s2] sm:$0x3]  ;;  %v751_v51 = vld [vmem:[%s1126_s5 + $0x3] ss:$0 sm:$0xff]  ;;  %s960_s2 = smov 64   ;;  %v337_v1 = vld [vmem:[%s1124_s3 + $0x8] sm:$0xff] }
  0x2a   :  { %vm58_vm3 = vmand %vm54_vm1, %vm57_vm2  ;;  %v745_v53 = vld [vmem:[%s1126_s5] ss:$0 sm:$0xff]  ;;  %v413_v5 = vld [vmem:[#allocation5 + $0x58] sm:$0xff] }
  0x2b   :  { %860 = vmatpush1.bf16.msra.mxu1 %v859_v26  ;;  %v59_v31 = vsel %vm58_vm3, 1.0, %v959_v7  ;;  %vm64_vm6 = vmand %vm60_vm4, %vm63_vm5  ;;  %v336_v0 = vld [vmem:[%s1124_s3] sm:$0xff]  ;;  %v414_v6 = vld [vmem:[#allocation5 + $0x90] sm:$0xff] }
  0x2c   :  { %849 = vmatpush3.bf16.msra.mxu0 %v848_v24  ;;  %v65_v32 = vsel %vm64_vm6, 1.0, %v59_v31  ;;  %862 = vmatprep.subr.bf16.mxu1 %v861_v35  ;;  %v870_v2 = vpack.c.bf16 %v337_v1, %v336_v0  ;;  %v412_v3 = vld [vmem:[#allocation5 + $0x20] sm:$0xff]  ;;  %v415_v9 = vld [vmem:[#allocation5 + $0xc8] sm:$0xff]  ;;  %v501_v21 = vld [vmem:[#allocation5 + $0x98] sm:$0xff] }
  0x2d   :  { %850 = vmatprep.subr.bf16.mxu0 %v957_v4  ;;  %v873_v8 = vpack.c.bf16 %v413_v5, %v412_v3  ;;  %v876_v11 = vpack.c.bf16 %v415_v9, %v414_v6  ;;  %v499_v18 = vld [vmem:[#allocation5 + $0x28] sm:$0xff]  ;;  %v500_v19 = vld [vmem:[#allocation5 + $0x60] sm:$0xff]  ;;  %v502_v22 = vld [vmem:[#allocation5 + $0xd0] sm:$0xff] }
  0x2e   :  { %v879_v20 = vpack.c.bf16 %v500_v19, %v499_v18  ;;  %v882_v23 = vpack.c.bf16 %v502_v22, %v501_v21  ;;  %v748_v25 = vld [vmem:[%s1126_s5 + $0x1] ss:$0 sm:$0xff]  ;;  %v623_v46 = vld [vmem:[#allocation5 + $0xd8] sm:$0xff] }
  0x30   :  { %852 = vmatpush3.bf16.msra.mxu0 %v851_v30 }
  0x31   :  { %869 = vmatprep.subr.bf16.mxu0 %v957_v4 }
  0x33   :  { %799 = vmatmul.mubr.msk.f32.vlgmr.msra.gmra.mrb[0].mxu0 %vm74_vm7, %v65_v32 }
  0x34   :  { %805 = vmatprep.mubr.msk.f32.mxu0 %vm958_vm0, %v959_v7  ;;  %871 = vmatpush3.bf16.msra.mxu0 %v870_v2 }
  0x35   :  { %878 = vmatprep.subr.bf16.mxu0 %v957_v4 }
 0x106   :  { %v144_v40 = vpop.f32.mrb[0].mxu0 }
 0x107   :  { %v148_v42 = vmax.f32 %v144_v40, 0.0  ;;  %v800_v43 = vpop.f32.mrb[1].mxu0 }
 0x108   :  { %v621_v43 = vld [vmem:[#allocation5 + $0x68] sm:$0xff] }
 0x109   :  { %743 = vmatmul.mubr.msk.f32.vlgmr.msra.gmra.mrb[0].mxu1 %vm158_vm8, %v148_v42  ;;  %v620_v42 = vld [vmem:[#allocation5 + $0x30] sm:$0xff] }
 0x10a   :  { %864 = vmatpush1.bf16.msra.mxu1 %v863_v41  ;;  %308 = vmatprep.mubr.f32.mxu1 %v959_v7  ;;  %v885_v45 = vpack.c.bf16 %v621_v43, %v620_v42 }
 0x10b   :  { %866 = vmatprep.subr.bf16.mxu1 %v865_v44  ;;  %v622_v44 = vld [vmem:[#allocation5 + $0xa0] sm:$0xff] }
 0x10e   :  { %868 = vmatpush1.bf16.msra.mxu1 %v867_v47  ;;  %v888_v47 = vpack.c.bf16 %v623_v46, %v622_v44 }
 0x10f   :  { %872 = vmatprep.subr.bf16.mxu1 %v957_v4 }
 0x111   :  { %744 = vmatmul.mubr.msk.f32.vlgmr.msra.gmra.mrb[2].mxu1 %vm158_vm8, %v1068_v48 }
 0x112   :  { %816 = vmatprep.mubr.msk.f32.mxu1 %vm958_vm0, %v959_v7  ;;  %874 = vmatpush3.bf16.msra.mxu1 %v873_v8 }
 0x113   :  { %875 = vmatprep.subr.bf16.mxu1 %v957_v4 }
 0x116   :  { %877 = vmatpush3.bf16.msra.mxu1 %v876_v11 }
 0x117   :  { %884 = vmatprep.subr.bf16.mxu1 %v957_v4 }
 0x1dc   :  { %v228_v49 = vpop.f32.mrb[0].mxu1 }
 0x1dd   :  { %v230_v50 = vpop.f32.mrb[1].mxu1 }
 0x1e4   :  { %v310_v52 = vpop.f32.mrb[2].mxu1 }
 0x1e5   :  { %v315_v54 = vadd.f32 %v310_v52, %v228_v49  ;;  %v312_v55 = vpop.f32.mrb[3].mxu1 }
 0x1e6   :  { %v590_v56 = vadd.f32 %v751_v51, %v312_v55 }
 0x1e7   :  { %v323_v57 = vadd.f32 %v745_v53, %v315_v54 }
 0x1e8   :  { %599 = vrot.lane.b32.xlu1 %v590_v56, %s960_s2 }
 0x1e9   :  { %v325_v58 = vsel %vm324_vm9, %v323_v57, -inf }
 0x1ea   :  { %326 = vmax.xlane.f32.xlu0 %v325_v58 }
 0x25a   :  { %v600_v38 = vpop.permute.xlu1 %599 }
 0x277   :  { %v327_v59 = vpop.xlane.xlu0 %326 }
 0x278   :  { %v328_v60 = vsub.f32 %v323_v57, %v327_v59 }
 0x27a   :  { %v329_v61 = vmul.f32 1.442695, %v328_v60 }
 0x27c   :  { %901 = vpow2.f32 %v329_v61  ;;  %v963_v61 = vmov 1983009808  }
 0x286   :  { %v902_v62 = vpop.eup %901 }
 0x287   :  { %v331_v63 = vsel %vm324_vm9, %v902_v62, 0.0 }
 0x288   :  { %332 = vadd.xlane.f32.xlu0 %v331_v63 }
 0x315   :  { %v333_v12 = vpop.xlane.xlu0 %332 }
 0x316   :  { %903 = vrcp.f32 %v333_v12 }
 0x320   :  { %v904_v13 = vpop.eup %903 }
 0x321   :  { %v335_v14 = vmul.f32 %v904_v13, %v902_v62  ;;  %v724_v62 = vunpack.c.l.s4 %v963_v61 }
 0x323   :  { %806 = vmatmul.mubr.msk.f32.vlgmr.msra.gmra.mrb[2].mxu0 %vm338_vm10, %v335_v14  ;;  %v725_v63 = vunpack.c.0.s8 %v724_v62 }
 0x324   :  { %827 = vmatprep.mubr.msk.f32.mxu0 %vm958_vm0, %v959_v7  ;;  %880 = vmatpush3.bf16.msra.mxu0 %v879_v20 }
 0x325   :  { %881 = vmatprep.subr.bf16.mxu0 %v957_v4  ;;  %v728_v0 = vsub.s32 %v725_v63, %v1037_v10 }
 0x328   :  { %883 = vmatpush3.bf16.msra.mxu0 %v882_v23 }
 0x3f6   :  { %v408_v16 = vpop.f32.mrb[2].mxu0 }
 0x3f7   :  { %v807_v17 = vpop.f32.mrb[3].mxu0  ;;  %817 = vmatmul.mubr.msk.f32.vlgmr.msra.gmra.mrb[4].mxu1 %vm158_vm8, %v408_v16 }
 0x3f8   :  { %838 = vmatprep.mubr.msk.f32.mxu1 %vm958_vm0, %v959_v7  ;;  %v749_v7 = vld [vmem:[%s1126_s5 + $0x2] ss:$0 sm:$0xff]  ;;  %886 = vmatpush3.bf16.msra.mxu1 %v885_v45 }
 0x3f9   :  { %887 = vmatprep.subr.bf16.mxu1 %v957_v4 }
 0x3fc   :  { %889 = vmatpush3.bf16.msra.mxu1 %v888_v47 }
 0x4ca   :  { %v485_v24 = vpop.f32.mrb[4].mxu1 }
 0x4cb   :  { %v489_v26 = vadd.f32 %v485_v24, %v230_v50  ;;  %v818_v27 = vpop.f32.mrb[5].mxu1 }
 0x4cd   :  { %v497_v28 = vadd.f32 %v748_v25, %v489_v26 }
 0x4cf   :  { %v498_v29 = vmax.f32 %v497_v28, 0.0 }
 0x4d1   :  { %828 = vmatmul.mubr.msk.f32.vlgmr.msra.gmra.mrb[4].mxu0 %vm158_vm8, %v498_v29 }
 0x5a4   :  { %v579_v30 = vpop.f32.mrb[4].mxu0 }
 0x5a5   :  { %v580_v31 = vadd.f32 %v749_v7, %v579_v30  ;;  %v829_v32 = vpop.f32.mrb[5].mxu0 }
 0x5a7   :  { %v591_v33 = vadd.f32 %v590_v56, %v580_v31  ;;  %v753_v56 = vld [vmem:[%s1126_s5 + $0x4] ss:$0 sm:$0xff] }
 0x5a9   :  { %v752_v34 = vmul.f32 -1.442695, %v591_v33 }
 0x5ab   :  { %905 = vpow2.f32 %v752_v34 }
 0x5b5   :  { %v906_v35 = vpop.eup %905 }
 0x5b6   :  { %v595_v36 = vadd.f32 1.0, %v906_v35 }
 0x5b8   :  { %907 = vrcp.f32 %v595_v36 }
 0x5c2   :  { %v908_v37 = vpop.eup %907 }
 0x5c3   :  { %v602_v39 = vmul.f32 %v908_v37, %v600_v38  ;;  %v609_v51 = vsub.f32 1.0, %v908_v37 }
 0x5c5   :  { %604 = vrot.lane.b32.xlu1 %v602_v39, %s960_s2 }
 0x5c9   :  { %615 = vrot.lane.b32.xlu1 %v1068_v48, %s961_s19 }
 0x637   :  { %v605_v40 = vpop.permute.xlu1 %604 }
 0x638   :  { %v607_v41 = vadd.f32 %v605_v40, %v580_v31 }
 0x63a   :  { %909 = vtanh.f32 %v607_v41 }
 0x63b   :  { %v616_v50 = vpop.permute.xlu1 %615 }
 0x63c   :  { %v618_v48 = vmul.f32 %v908_v37, %v616_v50 }
 0x644   :  { %v910_v49 = vpop.eup %909 }
 0x645   :  { %611 = vrot.lane.b32.xlu0 %v910_v49, %s962_s20 }
 0x6b7   :  { %v612_v52 = vpop.permute.xlu0 %611 }
 0x6b8   :  { %v614_v53 = vmul.f32 %v612_v52, %v609_v51 }
 0x6ba   :  { %v619_v54 = vadd.f32 %v618_v48, %v614_v53 }
 0x6bc   :  { %632 = vrot.lane.b32.xlu1 %v619_v54, %s962_s20  ;;  %v729_v1 = vrot.slane %v619_v54, %v728_v0 }
 0x72e   :  { %v633_v55 = vpop.permute.xlu1 %632 }
 0x72f   :  { %839 = vmatmul.mubr.msk.f32.vlgmr.msra.gmra.mrb[6].mxu1 %vm158_vm8, %v633_v55 }
 0x802   :  { %v702_v57 = vpop.f32.mrb[6].mxu1 }
 0x803   :  { %v703_v4 = vadd.f32 %v753_v56, %v702_v57  ;;  %v840_v58 = vpop.f32.mrb[7].mxu1 }
 0x805   :  { %v707_v59 = vsel %vm706_vm11, %v703_v4, -inf }
 0x806   :  { %v709_v60 = vsel %vm708_vm12, %v707_v59, -inf }
 0x807   :  { %710 = vmax.xlane.f32.xlu1 %v709_v60 }
 0x818   :  { %730 = vrot.lane.b32.xlu1 %v729_v1, %s962_s20 }
 0x894   :  { %v711_v2 = vpop.xlane.xlu1 %710 }
 0x895   :  { %v712_v3 = vsub.f32 %v707_v59, %v711_v2 }
 0x897   :  { %v713_v5 = vmul.f32 1.442695, %v712_v3 }
 0x898   :  { %v731_v6 = vpop.permute.xlu1 %730 }
 0x899   :  { %911 = vpow2.f32 %v713_v5  ;;  %734 = vst.msk [vmem:[%s1127_s6 + $0x2] sm:$0x3] %vm733_vm13, %v731_v6 }
 0x8a3   :  { %v912_v15 = vpop.eup %911 }
 0x8a4   :  { %v715_v8 = vsel %vm708_vm12, %v912_v15, 0.0 }
 0x8a5   :  { %716 = vadd.xlane.f32.xlu0 %v715_v8 }
 0x932   :  { %v717_v9 = vpop.xlane.xlu0 %716 }
 0x933   :  { %913 = vlog2.f32 %v717_v9 }
 0x93d   :  { %v914_v11 = vpop.eup %913 }
 0x93e   :  { %v719_v10 = vmul.f32 0.6931472, %v914_v11 }
 0x940   :  { %v720_v12 = vadd.f32 %v719_v10, %v711_v2 }
 0x942   :  { %v721_v13 = vsub.f32 %v707_v59, %v720_v12 }
 0x944   :  { %722 = vst [vmem:[%s1127_s6] sm:$0x3] %v721_v13 }
 0x945   :  { %739 = vsyncpa [#allocation3], 1 }
 0x946   :  { %740 = vsyncpa [#allocation4], 1 }

</bundles_post_ra>
